<compile_context>
chip_gen: v7x
topology: tpu7x:2x2x1
jax: 0.10.0
libtpu: 0.0.40
codegen_flags: <defaults>
</compile_context>

<pallas_src>
import jax
import jax.numpy as jnp
from jax.experimental import pallas as pl
from jax.experimental.pallas import tpu as pltpu


def lstm_dense_kernel(gi_ref, whh_ref, wd_ref, bd_ref, out_ref, h_scr, c_scr):
    """One grid step = TS LSTM time steps; last step fuses dense + sigmoid.

    gi_ref : (TS, B, 4H) bf16 -- precomputed x_t @ W_ih^T + b, time-major.
    whh_ref: (H, 4H)     bf16 -- fused recurrent weights (gate order i,f,g,o).
    wd_ref : (H, O) bf16, bd_ref: (1, O) f32, out_ref: (B, O) f32.
    h_scr/c_scr: (B, H) f32 VMEM scratch carried across grid steps.
    """
    s = pl.program_id(0)

    @pl.when(s == 0)
    def _():
        h_scr[...] = jnp.zeros_like(h_scr)
        c_scr[...] = jnp.zeros_like(c_scr)

    ts = gi_ref.shape[0]
    H = h_scr.shape[1]
    w_hh = whh_ref[...]                       # resident bf16 (H, 4H)

    def step(t, carry):
        h, c = carry
        # Single fused (B,H)@(H,4H) bf16 MXU matmul on the serial path;
        # gate math stays f32.
        gates = gi_ref[t].astype(jnp.float32) + jnp.dot(
            h.astype(jnp.bfloat16), w_hh, preferred_element_type=jnp.float32)
        i = jax.nn.sigmoid(gates[:, 0 * H:1 * H])
        f = jax.nn.sigmoid(gates[:, 1 * H:2 * H])
        g = jnp.tanh(gates[:, 2 * H:3 * H])
        o = jax.nn.sigmoid(gates[:, 3 * H:4 * H])
        c_new = f * c + i * g
        h_new = o * jnp.tanh(c_new)
        return h_new, c_new

    h0, c0 = h_scr[...], c_scr[...]
    h_last, c_last = jax.lax.fori_loop(0, ts, step, (h0, c0),
                                       unroll=min(ts, 4))
    h_scr[...] = h_last
    c_scr[...] = c_last

    @pl.when(s == pl.num_programs(0) - 1)
    def _():
        logits = jnp.dot(h_last.astype(jnp.bfloat16), wd_ref[...],
                         preferred_element_type=jnp.float32) + bd_ref[...]
        out_ref[...] = jax.nn.sigmoid(logits).astype(out_ref.dtype)


def _pick_time_tile(seq_len):
    """Largest power-of-two tile dividing seq_len, preferring >=2 grid steps."""
    for t in (64, 32, 16, 8, 4, 2, 1):
        if seq_len % t == 0 and (seq_len // t >= 2 or seq_len == t == 1):
            return t
    return 1


@jax.jit
def my_model_forward(tokens, kparams):
    """tokens: int32 [seq_len, batch] (nn.LSTM time-major). Returns [batch, out_dim]."""
    emb = kparams["embedding"]                              # (V, E) f32
    w_ih_t = kparams["w_ih_t"]                              # (E, 4H) f32
    b_gates = kparams["b_gates"]                            # (1, 4H) f32
    w_hh_bf16 = kparams["w_hh_bf16"]                        # (H, 4H) bf16
    w_dense_bf16 = kparams["w_dense_bf16"]                  # (H, O) bf16
    b_dense = kparams["b_dense"]                            # (1, O) f32

    S, B = tokens.shape
    H = w_hh_bf16.shape[0]
    O = w_dense_bf16.shape[1]
    G = 4 * H

    # Pad batch to full sublanes (multiple of 8); token id 0 is a valid index.
    B_pad = max(8, -(-B // 8) * 8)
    tokens_p = jnp.pad(tokens, ((0, 0), (0, B_pad - B)))

    # --- Off the serial path: embedding gather + one batched input projection
    # for all steps, kept time-major (free reshape) and cast to bf16 in HBM. ---
    x = jnp.take(emb, tokens_p, axis=0)                      # (S, Bp, E) glue
    proj = x.reshape(S * B_pad, -1) @ w_ih_t + b_gates       # (S*Bp, 4H) f32
    gate_inputs = proj.reshape(S, B_pad, G).astype(jnp.bfloat16)

    ts = _pick_time_tile(S)

    out = pl.pallas_call(
        lstm_dense_kernel,
        out_shape=jax.ShapeDtypeStruct((B_pad, O), jnp.float32),
        grid=(S // ts,),
        in_specs=[
            pl.BlockSpec((ts, B_pad, G), lambda s: (s, 0, 0)),   # streamed
            pl.BlockSpec((H, G), lambda s: (0, 0)),              # resident
            pl.BlockSpec((H, O), lambda s: (0, 0)),              # resident
            pl.BlockSpec((1, O), lambda s: (0, 0)),              # resident
        ],
        out_specs=pl.BlockSpec((B_pad, O), lambda s: (0, 0)),
        scratch_shapes=[
            pltpu.VMEM((B_pad, H), jnp.float32),   # h carry
            pltpu.VMEM((B_pad, H), jnp.float32),   # c carry
        ],
        compiler_params=pltpu.CompilerParams(
            dimension_semantics=("arbitrary",)),   # serial recurrence over S
    )(gate_inputs, w_hh_bf16, w_dense_bf16, b_dense)

    return out[:B]


def init_params(key, input_dim, embedding_dim, hidden_dim, output_dim):
    k = 1.0 / jnp.sqrt(hidden_dim)
    keys = jax.random.split(key, 7)
    u = lambda kk, shape, s: jax.random.uniform(kk, shape, jnp.float32, -s, s)
    return {
        "embedding": jax.random.normal(keys[0], (input_dim, embedding_dim),
                                       jnp.float32),
        # stored transposed: (E, 4H), (H, 4H); gate order i, f, g, o
        "w_ih_t": u(keys[1], (embedding_dim, 4 * hidden_dim), k),
        "w_hh_t": u(keys[2], (hidden_dim, 4 * hidden_dim), k),
        "b_gates": u(keys[3], (1, 4 * hidden_dim), k)
                   + u(keys[4], (1, 4 * hidden_dim), k),            # b_ih + b_hh
        "w_dense_t": u(keys[5], (hidden_dim, output_dim), k),
        "b_dense": u(keys[6], (1, output_dim), k),
    }


def prepare_kernel_params(params):
    """One-time (outside jit) weight prep: bf16 MXU operand copies, no relayouts."""
    return {
        "embedding": params["embedding"],
        "w_ih_t": params["w_ih_t"],
        "b_gates": params["b_gates"],
        "w_hh_bf16": params["w_hh_t"].astype(jnp.bfloat16),
        "w_dense_bf16": params["w_dense_t"].astype(jnp.bfloat16),
        "b_dense": params["b_dense"],
    }


def reference_forward(tokens, params):
    """Pure-JAX f32 reference mirroring torch: Embedding -> LSTM -> last step -> Linear -> Sigmoid."""
    x = jnp.take(params["embedding"], tokens, axis=0)   # (S, B, E)
    H = params["w_hh_t"].shape[0]
    B = x.shape[1]

    def step(carry, x_t):
        h, c = carry
        gates = x_t @ params["w_ih_t"] + h @ params["w_hh_t"] + params["b_gates"]
        i = jax.nn.sigmoid(gates[:, 0 * H:1 * H])
        f = jax.nn.sigmoid(gates[:, 1 * H:2 * H])
        g = jnp.tanh(gates[:, 2 * H:3 * H])
        o = jax.nn.sigmoid(gates[:, 3 * H:4 * H])
        c = f * c + i * g
        h = o * jnp.tanh(c)
        return (h, c), h

    h0 = jnp.zeros((B, H), jnp.float32)
    (_, _), hs = jax.lax.scan(step, (h0, h0), x)
    h_last = hs[-1]
    return jax.nn.sigmoid(h_last @ params["w_dense_t"] + params["b_dense"])


if __name__ == "__main__":
    input_dim, embedding_dim, hidden_dim, output_dim = 50, 32, 32, 8
    seq_len, batch = 8, 2

    key = jax.random.PRNGKey(0)
    k_tok, k_par = jax.random.split(key)
    tokens = jax.random.randint(k_tok, (seq_len, batch), 0, input_dim,
                                dtype=jnp.int32)
    params = init_params(k_par, input_dim, embedding_dim, hidden_dim, output_dim)
    kparams = prepare_kernel_params(params)

    out = my_model_forward(tokens, kparams)
    out = jax.block_until_ready(out)

    ref = jax.block_until_ready(reference_forward(tokens, params))
    assert out.shape == (batch, output_dim)
    # bf16 MXU operands vs f32 reference -> loosened tolerance per review.
    assert jnp.allclose(out, ref, atol=2e-2, rtol=2e-2), "mismatch vs reference"
    print("KERNEL_OK")
</pallas_src>

<mosaic_0001>
module attributes {stable_mosaic.version = 11 : i64} {
  func.func @lstm_dense_kernel(%arg0: i32, %arg1: memref<4x8x128xbf16, #tpu.memory_space<vmem>>, %arg2: memref<32x128xbf16, #tpu.memory_space<vmem>>, %arg3: memref<32x8xbf16, #tpu.memory_space<vmem>>, %arg4: memref<1x8xf32, #tpu.memory_space<vmem>>, %arg5: memref<8x8xf32, #tpu.memory_space<vmem>>, %arg6: memref<8x32xf32, #tpu.memory_space<vmem>>, %arg7: memref<8x32xf32, #tpu.memory_space<vmem>>) attributes {dimension_semantics = [#tpu.dimension_semantics<arbitrary>], iteration_bounds = array<i64: 2>, scalar_prefetch = 0 : i64, scratch_operands = 2 : i64, tpu.core_type = #tpu.core_type<tc>, window_params = [{transform_indices = @transform_0, window_bounds = array<i64: 4, 8, 128>}, {pipeline_mode = #tpu.pipeline_mode<synchronous>, transform_indices = @transform_1, window_bounds = array<i64: 32, 128>}, {pipeline_mode = #tpu.pipeline_mode<synchronous>, transform_indices = @transform_2, window_bounds = array<i64: 32, 8>}, {pipeline_mode = #tpu.pipeline_mode<synchronous>, transform_indices = @transform_3, window_bounds = array<i64: 1, 8>}, {pipeline_mode = #tpu.pipeline_mode<synchronous>, transform_indices = @transform_4, window_bounds = array<i64: 8, 8>}]} {
    %c0_i32 = arith.constant 0 : i32
    %0 = arith.cmpi eq, %arg0, %c0_i32 : i32
    %1 = arith.extui %0 : i1 to i32
    %c0_i32_0 = arith.constant 0 : i32
    %2 = arith.cmpi ne, %1, %c0_i32_0 : i32
    scf.if %2 {
      %cst_36 = arith.constant 0.000000e+00 : f32
      %139 = vector.broadcast %cst_36 : f32 to vector<8x32xf32>
      %c0_37 = arith.constant 0 : index
      %c0_38 = arith.constant 0 : index
      %140 = vector.load %arg6[%c0_37, %c0_38] : memref<8x32xf32, #tpu.memory_space<vmem>>, vector<8x32xf32>
      tpu.vector_store %arg6[%c0_37, %c0_38], %139 {strides = array<i32>} : memref<8x32xf32, #tpu.memory_space<vmem>>, vector<8x32xf32>,
      %cst_39 = arith.constant 0.000000e+00 : f32
      %141 = vector.broadcast %cst_39 : f32 to vector<8x32xf32>
      %c0_40 = arith.constant 0 : index
      %c0_41 = arith.constant 0 : index
      %142 = vector.load %arg7[%c0_40, %c0_41] : memref<8x32xf32, #tpu.memory_space<vmem>>, vector<8x32xf32>
      tpu.vector_store %arg7[%c0_40, %c0_41], %141 {strides = array<i32>} : memref<8x32xf32, #tpu.memory_space<vmem>>, vector<8x32xf32>,
    } else {
    }
    %c0 = arith.constant 0 : index
    %c0_1 = arith.constant 0 : index
    %3 = vector.load %arg2[%c0, %c0_1] : memref<32x128xbf16, #tpu.memory_space<vmem>>, vector<32x128xbf16>
    %c0_2 = arith.constant 0 : index
    %c0_3 = arith.constant 0 : index
    %4 = vector.load %arg6[%c0_2, %c0_3] : memref<8x32xf32, #tpu.memory_space<vmem>>, vector<8x32xf32>
    %c0_4 = arith.constant 0 : index
    %c0_5 = arith.constant 0 : index
    %5 = vector.load %arg7[%c0_4, %c0_5] : memref<8x32xf32, #tpu.memory_space<vmem>>, vector<8x32xf32>
    %c0_i32_6 = arith.constant 0 : i32
    %6 = arith.index_cast %c0_i32_6 : i32 to index
    %c0_7 = arith.constant 0 : index
    %c0_8 = arith.constant 0 : index
    %7 = vector.load %arg1[%6, %c0_7, %c0_8] : memref<4x8x128xbf16, #tpu.memory_space<vmem>>, vector<1x8x128xbf16>
    %8 = vector.shape_cast %7 : vector<1x8x128xbf16> to vector<8x128xbf16>
    %9 = arith.extf %8 : vector<8x128xbf16> to vector<8x128xf32>
    %10 = arith.truncf %4 : vector<8x32xf32> to vector<8x32xbf16>
    %cst = arith.constant dense<0.000000e+00> : vector<8x128xf32>
    %11 = tpu.matmul %10, %3, %cst {dimension_numbers = #tpu.dot_dimension_numbers<[1], [0], [0], [1], [0, 0, 1, 1], [], []>} : vector<8x32xbf16>, vector<32x128xbf16>, vector<8x128xf32> -> vector<8x128xf32>
    %12 = arith.addf %9, %11 : vector<8x128xf32>
    %13 = vector.extract_strided_slice %12 {offsets = [0, 0], sizes = [8, 32], strides = [1, 1]} : vector<8x128xf32> to vector<8x32xf32>
    %14 = arith.negf %13 : vector<8x32xf32>
    %15 = math.exp %14 : vector<8x32xf32>
    %cst_9 = arith.constant 1.000000e+00 : f32
    %16 = vector.broadcast %cst_9 : f32 to vector<8x32xf32>
    %17 = arith.addf %16, %15 : vector<8x32xf32>
    %18 = arith.divf %16, %17 : vector<8x32xf32>
    %19 = vector.extract_strided_slice %12 {offsets = [0, 32], sizes = [8, 32], strides = [1, 1]} : vector<8x128xf32> to vector<8x32xf32>
    %20 = arith.negf %19 : vector<8x32xf32>
    %21 = math.exp %20 : vector<8x32xf32>
    %cst_10 = arith.constant 1.000000e+00 : f32
    %22 = vector.broadcast %cst_10 : f32 to vector<8x32xf32>
    %23 = arith.addf %22, %21 : vector<8x32xf32>
    %24 = arith.divf %22, %23 : vector<8x32xf32>
    %25 = vector.extract_strided_slice %12 {offsets = [0, 64], sizes = [8, 32], strides = [1, 1]} : vector<8x128xf32> to vector<8x32xf32>
    %26 = math.tanh %25 : vector<8x32xf32>
    %27 = vector.extract_strided_slice %12 {offsets = [0, 96], sizes = [8, 32], strides = [1, 1]} : vector<8x128xf32> to vector<8x32xf32>
    %28 = arith.negf %27 : vector<8x32xf32>
    %29 = math.exp %28 : vector<8x32xf32>
    %cst_11 = arith.constant 1.000000e+00 : f32
    %30 = vector.broadcast %cst_11 : f32 to vector<8x32xf32>
    %31 = arith.addf %30, %29 : vector<8x32xf32>
    %32 = arith.divf %30, %31 : vector<8x32xf32>
    %33 = arith.mulf %24, %5 : vector<8x32xf32>
    %34 = arith.mulf %18, %26 : vector<8x32xf32>
    %35 = arith.addf %33, %34 : vector<8x32xf32>
    %36 = math.tanh %35 : vector<8x32xf32>
    %37 = arith.mulf %32, %36 : vector<8x32xf32>
    %c1_i32 = arith.constant 1 : i32
    %38 = arith.index_cast %c1_i32 : i32 to index
    %c0_12 = arith.constant 0 : index
    %c0_13 = arith.constant 0 : index
    %39 = vector.load %arg1[%38, %c0_12, %c0_13] : memref<4x8x128xbf16, #tpu.memory_space<vmem>>, vector<1x8x128xbf16>
    %40 = vector.shape_cast %39 : vector<1x8x128xbf16> to vector<8x128xbf16>
    %41 = arith.extf %40 : vector<8x128xbf16> to vector<8x128xf32>
    %42 = arith.truncf %37 : vector<8x32xf32> to vector<8x32xbf16>
    %cst_14 = arith.constant dense<0.000000e+00> : vector<8x128xf32>
    %43 = tpu.matmul %42, %3, %cst_14 {dimension_numbers = #tpu.dot_dimension_numbers<[1], [0], [0], [1], [0, 0, 1, 1], [], []>} : vector<8x32xbf16>, vector<32x128xbf16>, vector<8x128xf32> -> vector<8x128xf32>
    %44 = arith.addf %41, %43 : vector<8x128xf32>
    %45 = vector.extract_strided_slice %44 {offsets = [0, 0], sizes = [8, 32], strides = [1, 1]} : vector<8x128xf32> to vector<8x32xf32>
    %46 = arith.negf %45 : vector<8x32xf32>
    %47 = math.exp %46 : vector<8x32xf32>
    %cst_15 = arith.constant 1.000000e+00 : f32
    %48 = vector.broadcast %cst_15 : f32 to vector<8x32xf32>
    %49 = arith.addf %48, %47 : vector<8x32xf32>
    %50 = arith.divf %48, %49 : vector<8x32xf32>
    %51 = vector.extract_strided_slice %44 {offsets = [0, 32], sizes = [8, 32], strides = [1, 1]} : vector<8x128xf32> to vector<8x32xf32>
    %52 = arith.negf %51 : vector<8x32xf32>
    %53 = math.exp %52 : vector<8x32xf32>
    %cst_16 = arith.constant 1.000000e+00 : f32
    %54 = vector.broadcast %cst_16 : f32 to vector<8x32xf32>
    %55 = arith.addf %54, %53 : vector<8x32xf32>
    %56 = arith.divf %54, %55 : vector<8x32xf32>
    %57 = vector.extract_strided_slice %44 {offsets = [0, 64], sizes = [8, 32], strides = [1, 1]} : vector<8x128xf32> to vector<8x32xf32>
    %58 = math.tanh %57 : vector<8x32xf32>
    %59 = vector.extract_strided_slice %44 {offsets = [0, 96], sizes = [8, 32], strides = [1, 1]} : vector<8x128xf32> to vector<8x32xf32>
    %60 = arith.negf %59 : vector<8x32xf32>
    %61 = math.exp %60 : vector<8x32xf32>
    %cst_17 = arith.constant 1.000000e+00 : f32
    %62 = vector.broadcast %cst_17 : f32 to vector<8x32xf32>
    %63 = arith.addf %62, %61 : vector<8x32xf32>
    %64 = arith.divf %62, %63 : vector<8x32xf32>
    %65 = arith.mulf %56, %35 : vector<8x32xf32>
    %66 = arith.mulf %50, %58 : vector<8x32xf32>
    %67 = arith.addf %65, %66 : vector<8x32xf32>
    %68 = math.tanh %67 : vector<8x32xf32>
    %69 = arith.mulf %64, %68 : vector<8x32xf32>
    %c2_i32 = arith.constant 2 : i32
    %70 = arith.index_cast %c2_i32 : i32 to index
    %c0_18 = arith.constant 0 : index
    %c0_19 = arith.constant 0 : index
    %71 = vector.load %arg1[%70, %c0_18, %c0_19] : memref<4x8x128xbf16, #tpu.memory_space<vmem>>, vector<1x8x128xbf16>
    %72 = vector.shape_cast %71 : vector<1x8x128xbf16> to vector<8x128xbf16>
    %73 = arith.extf %72 : vector<8x128xbf16> to vector<8x128xf32>
    %74 = arith.truncf %69 : vector<8x32xf32> to vector<8x32xbf16>
    %cst_20 = arith.constant dense<0.000000e+00> : vector<8x128xf32>
    %75 = tpu.matmul %74, %3, %cst_20 {dimension_numbers = #tpu.dot_dimension_numbers<[1], [0], [0], [1], [0, 0, 1, 1], [], []>} : vector<8x32xbf16>, vector<32x128xbf16>, vector<8x128xf32> -> vector<8x128xf32>
    %76 = arith.addf %73, %75 : vector<8x128xf32>
    %77 = vector.extract_strided_slice %76 {offsets = [0, 0], sizes = [8, 32], strides = [1, 1]} : vector<8x128xf32> to vector<8x32xf32>
    %78 = arith.negf %77 : vector<8x32xf32>
    %79 = math.exp %78 : vector<8x32xf32>
    %cst_21 = arith.constant 1.000000e+00 : f32
    %80 = vector.broadcast %cst_21 : f32 to vector<8x32xf32>
    %81 = arith.addf %80, %79 : vector<8x32xf32>
    %82 = arith.divf %80, %81 : vector<8x32xf32>
    %83 = vector.extract_strided_slice %76 {offsets = [0, 32], sizes = [8, 32], strides = [1, 1]} : vector<8x128xf32> to vector<8x32xf32>
    %84 = arith.negf %83 : vector<8x32xf32>
    %85 = math.exp %84 : vector<8x32xf32>
    %cst_22 = arith.constant 1.000000e+00 : f32
    %86 = vector.broadcast %cst_22 : f32 to vector<8x32xf32>
    %87 = arith.addf %86, %85 : vector<8x32xf32>
    %88 = arith.divf %86, %87 : vector<8x32xf32>
    %89 = vector.extract_strided_slice %76 {offsets = [0, 64], sizes = [8, 32], strides = [1, 1]} : vector<8x128xf32> to vector<8x32xf32>
    %90 = math.tanh %89 : vector<8x32xf32>
    %91 = vector.extract_strided_slice %76 {offsets = [0, 96], sizes = [8, 32], strides = [1, 1]} : vector<8x128xf32> to vector<8x32xf32>
    %92 = arith.negf %91 : vector<8x32xf32>
    %93 = math.exp %92 : vector<8x32xf32>
    %cst_23 = arith.constant 1.000000e+00 : f32
    %94 = vector.broadcast %cst_23 : f32 to vector<8x32xf32>
    %95 = arith.addf %94, %93 : vector<8x32xf32>
    %96 = arith.divf %94, %95 : vector<8x32xf32>
    %97 = arith.mulf %88, %67 : vector<8x32xf32>
    %98 = arith.mulf %82, %90 : vector<8x32xf32>
    %99 = arith.addf %97, %98 : vector<8x32xf32>
    %100 = math.tanh %99 : vector<8x32xf32>
    %101 = arith.mulf %96, %100 : vector<8x32xf32>
    %c3_i32 = arith.constant 3 : i32
    %102 = arith.index_cast %c3_i32 : i32 to index
    %c0_24 = arith.constant 0 : index
    %c0_25 = arith.constant 0 : index
    %103 = vector.load %arg1[%102, %c0_24, %c0_25] : memref<4x8x128xbf16, #tpu.memory_space<vmem>>, vector<1x8x128xbf16>
    %104 = vector.shape_cast %103 : vector<1x8x128xbf16> to vector<8x128xbf16>
    %105 = arith.extf %104 : vector<8x128xbf16> to vector<8x128xf32>
    %106 = arith.truncf %101 : vector<8x32xf32> to vector<8x32xbf16>
    %cst_26 = arith.constant dense<0.000000e+00> : vector<8x128xf32>
    %107 = tpu.matmul %106, %3, %cst_26 {dimension_numbers = #tpu.dot_dimension_numbers<[1], [0], [0], [1], [0, 0, 1, 1], [], []>} : vector<8x32xbf16>, vector<32x128xbf16>, vector<8x128xf32> -> vector<8x128xf32>
    %108 = arith.addf %105, %107 : vector<8x128xf32>
    %109 = vector.extract_strided_slice %108 {offsets = [0, 0], sizes = [8, 32], strides = [1, 1]} : vector<8x128xf32> to vector<8x32xf32>
    %110 = arith.negf %109 : vector<8x32xf32>
    %111 = math.exp %110 : vector<8x32xf32>
    %cst_27 = arith.constant 1.000000e+00 : f32
    %112 = vector.broadcast %cst_27 : f32 to vector<8x32xf32>
    %113 = arith.addf %112, %111 : vector<8x32xf32>
    %114 = arith.divf %112, %113 : vector<8x32xf32>
    %115 = vector.extract_strided_slice %108 {offsets = [0, 32], sizes = [8, 32], strides = [1, 1]} : vector<8x128xf32> to vector<8x32xf32>
    %116 = arith.negf %115 : vector<8x32xf32>
    %117 = math.exp %116 : vector<8x32xf32>
    %cst_28 = arith.constant 1.000000e+00 : f32
    %118 = vector.broadcast %cst_28 : f32 to vector<8x32xf32>
    %119 = arith.addf %118, %117 : vector<8x32xf32>
    %120 = arith.divf %118, %119 : vector<8x32xf32>
    %121 = vector.extract_strided_slice %108 {offsets = [0, 64], sizes = [8, 32], strides = [1, 1]} : vector<8x128xf32> to vector<8x32xf32>
    %122 = math.tanh %121 : vector<8x32xf32>
    %123 = vector.extract_strided_slice %108 {offsets = [0, 96], sizes = [8, 32], strides = [1, 1]} : vector<8x128xf32> to vector<8x32xf32>
    %124 = arith.negf %123 : vector<8x32xf32>
    %125 = math.exp %124 : vector<8x32xf32>
    %cst_29 = arith.constant 1.000000e+00 : f32
    %126 = vector.broadcast %cst_29 : f32 to vector<8x32xf32>
    %127 = arith.addf %126, %125 : vector<8x32xf32>
    %128 = arith.divf %126, %127 : vector<8x32xf32>
    %129 = arith.mulf %120, %99 : vector<8x32xf32>
    %130 = arith.mulf %114, %122 : vector<8x32xf32>
    %131 = arith.addf %129, %130 : vector<8x32xf32>
    %132 = math.tanh %131 : vector<8x32xf32>
    %133 = arith.mulf %128, %132 : vector<8x32xf32>
    %c4_i32 = arith.constant 4 : i32
    %c0_30 = arith.constant 0 : index
    %c0_31 = arith.constant 0 : index
    %134 = vector.load %arg6[%c0_30, %c0_31] : memref<8x32xf32, #tpu.memory_space<vmem>>, vector<8x32xf32>
    tpu.vector_store %arg6[%c0_30, %c0_31], %133 {strides = array<i32>} : memref<8x32xf32, #tpu.memory_space<vmem>>, vector<8x32xf32>,
    %c0_32 = arith.constant 0 : index
    %c0_33 = arith.constant 0 : index
    %135 = vector.load %arg7[%c0_32, %c0_33] : memref<8x32xf32, #tpu.memory_space<vmem>>, vector<8x32xf32>
    tpu.vector_store %arg7[%c0_32, %c0_33], %131 {strides = array<i32>} : memref<8x32xf32, #tpu.memory_space<vmem>>, vector<8x32xf32>,
    %c1_i32_34 = arith.constant 1 : i32
    %136 = arith.cmpi eq, %arg0, %c1_i32_34 : i32
    %137 = arith.extui %136 : i1 to i32
    %c0_i32_35 = arith.constant 0 : i32
    %138 = arith.cmpi ne, %137, %c0_i32_35 : i32
    scf.if %138 {
      %139 = arith.truncf %133 : vector<8x32xf32> to vector<8x32xbf16>
      %c0_36 = arith.constant 0 : index
      %c0_37 = arith.constant 0 : index
      %140 = vector.load %arg3[%c0_36, %c0_37] : memref<32x8xbf16, #tpu.memory_space<vmem>>, vector<32x8xbf16>
      %cst_38 = arith.constant dense<0.000000e+00> : vector<8x8xf32>
      %141 = tpu.matmul %139, %140, %cst_38 {dimension_numbers = #tpu.dot_dimension_numbers<[1], [0], [0], [1], [0, 0, 1, 1], [], []>} : vector<8x32xbf16>, vector<32x8xbf16>, vector<8x8xf32> -> vector<8x8xf32>
      %c0_39 = arith.constant 0 : index
      %c0_40 = arith.constant 0 : index
      %142 = vector.load %arg4[%c0_39, %c0_40] : memref<1x8xf32, #tpu.memory_space<vmem>>, vector<1x8xf32>
      %143 = vector.broadcast %142 : vector<1x8xf32> to vector<8x8xf32>
      %144 = arith.addf %141, %143 : vector<8x8xf32>
      %145 = arith.negf %144 : vector<8x8xf32>
      %146 = math.exp %145 : vector<8x8xf32>
      %cst_41 = arith.constant 1.000000e+00 : f32
      %147 = vector.broadcast %cst_41 : f32 to vector<8x8xf32>
      %148 = arith.addf %147, %146 : vector<8x8xf32>
      %149 = arith.divf %147, %148 : vector<8x8xf32>
      %c0_42 = arith.constant 0 : index
      %c0_43 = arith.constant 0 : index
      %150 = vector.load %arg5[%c0_42, %c0_43] : memref<8x8xf32, #tpu.memory_space<vmem>>, vector<8x8xf32>
      tpu.vector_store %arg5[%c0_42, %c0_43], %149 {strides = array<i32>} : memref<8x8xf32, #tpu.memory_space<vmem>>, vector<8x8xf32>,
    } else {
    }
    return
  }
  func.func @transform_0(%arg0: i32) -> (i32, i32, i32) {
    %c0_i32 = arith.constant 0 : i32
    %c0_i32_0 = arith.constant 0 : i32
    %c0_i32_1 = arith.constant 0 : i32
    return %arg0, %c0_i32, %c0_i32_0 : i32, i32, i32
  }
  func.func @transform_1(%arg0: i32) -> (i32, i32) {
    %c0_i32 = arith.constant 0 : i32
    %c0_i32_0 = arith.constant 0 : i32
    %c0_i32_1 = arith.constant 0 : i32
    return %c0_i32, %c0_i32_0 : i32, i32
  }
  func.func @transform_2(%arg0: i32) -> (i32, i32) {
    %c0_i32 = arith.constant 0 : i32
    %c0_i32_0 = arith.constant 0 : i32
    %c0_i32_1 = arith.constant 0 : i32
    return %c0_i32, %c0_i32_0 : i32, i32
  }
  func.func @transform_3(%arg0: i32) -> (i32, i32) {
    %c0_i32 = arith.constant 0 : i32
    %c0_i32_0 = arith.constant 0 : i32
    %c0_i32_1 = arith.constant 0 : i32
    return %c0_i32, %c0_i32_0 : i32, i32
  }
  func.func @transform_4(%arg0: i32) -> (i32, i32) {
    %c0_i32 = arith.constant 0 : i32
    %c0_i32_0 = arith.constant 0 : i32
    %c0_i32_1 = arith.constant 0 : i32
    return %c0_i32, %c0_i32_0 : i32, i32
  }
}

</mosaic_0001>

<bundles_post_ra>
// kernel: my_model_forward.1
= control target key start
LH: loop header
LB: loop body
LE: loop exit
PB: predicated region body
PF: predicated region fallthrough
CT: control target
= control target key end

     0   :  { %s814_s15 = smov 0   ;;  %s883_s0 = inlined_call_operand.vmem [shape: bf16[8,8,128], index: 0, kind: input, shape index: {}]   ;;  %s884_s1 = inlined_call_operand.vmem [shape: bf16[32,128], index: 1, kind: input, shape index: {}]   ;;  %s885_s2 = inlined_call_operand.vmem [shape: bf16[32,8], index: 2, kind: input, shape index: {}]   ;;  %s886_s3 = inlined_call_operand.vmem [shape: f32[1,8], index: 3, kind: input, shape index: {}]   ;;  %s887_s4 = inlined_call_operand.vmem [shape: f32[8,8], index: 4, kind: output, shape index: {}]  }
   0x1 LB: > { %s820_s16 = sadd.s32 4294967295, %s778_s15   ;;  %p635_p0 = scmp.ge.s32.totalorder %s778_s15, 1  ;;  %s778_s15 = sphi %s814_s15, %s14_s15  }
   0x2   : > { %p158_p1 = scmp.lt.s32.totalorder %s778_s15, 3 }
   0x4   : > { %p159_p2 = pnand %p635_p0, %p158_p1 }
   0x5   : > { %s636_s17 = sshll.u32 (!%p159_p2), %s820_s16, 2  ;;  %p638_p4 = scmp.ne.s32.totalorder (!%p159_p2), %s820_s16, 0 }
   0x6   : > { %162 = sbr.rel (%p159_p2) target bundleno = 3088 (0xc10), region = 36  ;;  %p180_p3 = scmp.lt.s32.totalorder (!%p159_p2), %s636_s17, 7 }
   0xd   : > { %s889_s17 = smov (!%p180_p3, %s636_s17), 7  ;;  %189 = sbr.rel (%p638_p4) target bundleno = 20 (0x14), region = 40 }
   0xe   : > { %s637_s18 = sshll.u32 %s889_s17, 2  ;;  %vm190_vm0 = vcmask (!%p638_p4), 261120   ;;  %v780_v0 = vmov (!%p638_p4), 0.0  }
   0xf   : > { %s828_s21 = scalar_lea.vmem %s883_s0, %s637_s18  ;;  %191 = vst.msk [vmem:[#allocation2] sm:$0xff] (!%p638_p4), %vm190_vm0, %v780_v0  ;;  %192 = vst.msk [vmem:[#allocation3] sm:$0xff] (!%p638_p4), %vm190_vm0, %v780_v0 }
  0x14 PF: > { %v732_v1 = vld [vmem:[%s884_s1] sm:$0xff]   ;;  %v781_v2 = vmov 0.0   ;;  %v733_v3 = vld [vmem:[%s884_s1 + $0x8] sm:$0xff]   ;;  %vm782_vm1 = vmmov 0   ;;  %vm214_vm2 = vcmask 261120   ;;  %s783_s26 = smov 64  }
  0x15   : > { %675 = vmatprep.subr.bf16.mxu0 %v781_v2  ;;  %683 = vmatprep.subr.bf16.mxu1 %v781_v2  ;;  %v199_v6 = vld [vmem:[%s828_s21] sm:$0xff]   ;;  %s784_s27 = smov 32   ;;  %v646_v51 = vld [vmem:[%s828_s21 + $0x8] sm:$0xff]   ;;  %s785_s28 = smov 96  }
  0x16   : > { %676 = vmatpush3.bf16.msra.mxu0 %v732_v1  ;;  %679 = vmatprep.mubr.msk.bf16.mxu0 %vm782_vm1, %v781_v2  ;;  %v197_v4 = vld [vmem:[#allocation2] sm:$0xff]  ;;  %v200_v7 = vunpack.c.l.bf16 %v199_v6  ;;  %v198_v14 = vld [vmem:[#allocation3] sm:$0xff]  ;;  %v289_v30 = vunpack.c.h.bf16 %v199_v6  ;;  %v364_v52 = vunpack.c.l.bf16 %v646_v51  ;;  %p652_p5 = scmp.ne.s32.totalorder %s820_s16, 1 }
  0x17   : > { %677 = vmatprep.subr.bf16.mxu0 %v781_v2  ;;  %684 = vmatpush3.bf16.msra.mxu1 %v732_v1  ;;  %v201_v5 = vpack.c.bf16 %v197_v4, %v197_v4  ;;  %s787_s5 = smov (!%p652_p5), 32   ;;  %vm788_vm3 = vmmov (!%p652_p5), 0   ;;  %vm602_vm4 = vcmask (!%p652_p5), 64512  }
  0x18   : > { %685 = vmatprep.subr.bf16.mxu1 %v781_v2  ;;  %687 = vmatprep.mubr.msk.bf16.mxu1 %vm782_vm1, %v781_v2 }
  0x1a   : > { %678 = vmatpush3.bf16.msra.mxu0 %v733_v3 }
  0x1b   : > { %686 = vmatpush3.bf16.msra.mxu1 %v733_v3  ;;  %691 = vmatprep.subr.bf16.mxu0 %v781_v2 }
  0x1c   : > { %699 = vmatprep.subr.bf16.mxu1 %v781_v2 }
  0x1d   : > { %680 = vmatmul.mubr.msk.bf16.vlgmr.msra.gmra.mrb[0].mxu0 %vm214_vm2, %v201_v5 }
  0x1e   : > { %692 = vmatpush3.bf16.msra.mxu0 %v732_v1  ;;  %695 = vmatprep.mubr.msk.bf16.mxu0 %vm782_vm1, %v781_v2 }
  0x1f   : > { %693 = vmatprep.subr.bf16.mxu0 %v781_v2 }
  0x22   : > { %694 = vmatpush3.bf16.msra.mxu0 %v733_v3 }
  0xf0   : > { %v252_v8 = vpop.f32.mrb[0].mxu0 }
  0xf1   : > { %v258_v9 = vadd.f32 %v252_v8, %v200_v7  ;;  %v681_v10 = vpop.f32.mrb[1].mxu0 }
  0xf2   : > { %v255_v11 = vpop.f32.mrb[2].mxu0 }
  0xf3   : > { %734 = vtanh.f32 %v258_v9  ;;  %v682_v12 = vpop.f32.mrb[3].mxu0  ;;  %v642_v15 = vmul.f32 -1.442695, %v258_v9  ;;  %v439_v9 = vunpack.c.h.bf16 %v646_v51 }
  0xf5   : > { %736 = vpow2.f32 %v642_v15 }
  0xfd   : > { %v735_v13 = vpop.eup %734 }
  0xfe   : > { %272 = vrot.lane.b32.xlu0 %v735_v13, %s783_s26 }
  0xff   : > { %v737_v16 = vpop.eup %736 }
 0x100   : > { %v262_v17 = vadd.f32 1.0, %v737_v16 }
 0x102   : > { %267 = vrot.lane.b32.xlu0 %v198_v14, %s784_s27  ;;  %738 = vrcp.f32 %v262_v17 }
 0x10c   : > { %v739_v18 = vpop.eup %738 }
 0x170   : > { %v273_v19 = vpop.permute.xlu0 %272 }
 0x171   : > { %v275_v20 = vmul.f32 %v739_v18, %v273_v19 }
 0x173   : > { %277 = vrot.lane.b32.xlu1 %v275_v20, %s784_s27 }
 0x174   : > { %v268_v21 = vpop.permute.xlu0 %267 }
 0x175   : > { %v270_v22 = vmul.f32 %v739_v18, %v268_v21 }
 0x1e5   : > { %v278_v23 = vpop.permute.xlu1 %277 }
 0x1e6   : > { %v280_v24 = vadd.f32 %v278_v23, %v270_v22 }
 0x1e8   : > { %740 = vtanh.f32 %v280_v24 }
 0x1f2   : > { %v741_v25 = vpop.eup %740 }
 0x1f3   : > { %283 = vrot.lane.b32.xlu1 %v741_v25, %s783_s26 }
 0x265   : > { %v284_v26 = vpop.permute.xlu1 %283 }
 0x266   : > { %v286_v27 = vmul.f32 %v739_v18, %v284_v26 }
 0x268   : > { %v290_v28 = vpack.c.bf16 %v286_v27, %v286_v27 }
 0x26a   : > { %292 = vrot.lane.b32.xlu0 %v290_v28, %s784_s27 }
 0x2dc   : > { %v293_v29 = vpop.permute.xlu0 %292 }
 0x2dd   : > { %688 = vmatmul.mubr.msk.bf16.vlgmr.msra.gmra.mrb[0].mxu1 %vm214_vm2, %v293_v29 }
 0x2de   : > { %700 = vmatpush3.bf16.msra.mxu1 %v732_v1  ;;  %703 = vmatprep.mubr.msk.bf16.mxu1 %vm782_vm1, %v781_v2 }
 0x2df   : > { %701 = vmatprep.subr.bf16.mxu1 %v781_v2 }
 0x2e2   : > { %702 = vmatpush3.bf16.msra.mxu1 %v733_v3 }
 0x3b0   : > { %v331_v31 = vpop.f32.mrb[0].mxu1 }
 0x3b1   : > { %v337_v32 = vadd.f32 %v331_v31, %v289_v30  ;;  %v689_v33 = vpop.f32.mrb[1].mxu1  ;;  %v786_v31 = vmov (!%p652_p5), 0.0  }
 0x3b2   : > { %v334_v34 = vpop.f32.mrb[2].mxu1  ;;  %707 = vmatprep.subr.bf16.mxu0 (!%p652_p5), %v786_v31  ;;  %v767_v33 = vld [vmem:[%s885_s2 + $0x8] sm:$0xff] (!%p652_p5)  }
 0x3b3   : > { %742 = vtanh.f32 %v337_v32  ;;  %v690_v35 = vpop.f32.mrb[3].mxu1  ;;  %v645_v37 = vmul.f32 -1.442695, %v337_v32  ;;  %v766_v32 = vld [vmem:[%s885_s2] sm:$0xff] (!%p652_p5)  }
 0x3b4   : > { %v653_v35 = vld [vmem:[%s886_s3] ss:$0 sm:$0xff] (!%p652_p5) }
 0x3b5   : > { %744 = vpow2.f32 %v645_v37 }
 0x3bd   : > { %v743_v36 = vpop.eup %742 }
 0x3be   : > { %347 = vrot.lane.b32.xlu1 %v743_v36, %s783_s26 }
 0x3bf   : > { %v745_v38 = vpop.eup %744 }
 0x3c0   : > { %v341_v39 = vadd.f32 1.0, %v745_v38 }
 0x3c2   : > { %746 = vrcp.f32 %v341_v39 }
 0x3cc   : > { %v747_v40 = vpop.eup %746 }
 0x3cd   : > { %v345_v43 = vmul.f32 %v747_v40, %v280_v24 }
 0x430   : > { %v348_v41 = vpop.permute.xlu1 %347 }
 0x431   : > { %v350_v42 = vmul.f32 %v747_v40, %v348_v41 }
 0x433   : > { %352 = vrot.lane.b32.xlu0 %v350_v42, %s784_s27 }
 0x4a5   : > { %v353_v44 = vpop.permute.xlu0 %352 }
 0x4a6   : > { %v355_v45 = vadd.f32 %v353_v44, %v345_v43 }
 0x4a8   : > { %748 = vtanh.f32 %v355_v45 }
 0x4b2   : > { %v749_v46 = vpop.eup %748 }
 0x4b3   : > { %358 = vrot.lane.b32.xlu1 %v749_v46, %s783_s26 }
 0x525   : > { %v359_v47 = vpop.permute.xlu1 %358 }
 0x526   : > { %v361_v48 = vmul.f32 %v747_v40, %v359_v47 }
 0x528   : > { %v365_v49 = vpack.c.bf16 %v361_v48, %v361_v48 }
 0x52a   : > { %367 = vrot.lane.b32.xlu0 %v365_v49, %s784_s27 }
 0x59c   : > { %v368_v50 = vpop.permute.xlu0 %367 }
 0x59d   : > { %696 = vmatmul.mubr.msk.bf16.vlgmr.msra.gmra.mrb[4].mxu0 %vm214_vm2, %v368_v50 }
 0x59e   : > { %711 = vmatprep.mubr.msk.bf16.mxu0 (!%p652_p5), %vm788_vm3, %v786_v31  ;;  %708 = vmatpush3.bf16.msra.mxu0 (!%p652_p5), %v766_v32 }
 0x59f   : > { %709 = vmatprep.subr.bf16.mxu0 (!%p652_p5), %v786_v31 }
 0x5a2   : > { %710 = vmatpush3.bf16.msra.mxu0 (!%p652_p5), %v767_v33 }
 0x670   : > { %v406_v53 = vpop.f32.mrb[4].mxu0 }
 0x671   : > { %v412_v54 = vadd.f32 %v406_v53, %v364_v52  ;;  %v697_v55 = vpop.f32.mrb[5].mxu0 }
 0x672   : > { %v409_v56 = vpop.f32.mrb[6].mxu0 }
 0x673   : > { %750 = vtanh.f32 %v412_v54  ;;  %v698_v57 = vpop.f32.mrb[7].mxu0  ;;  %v648_v59 = vmul.f32 -1.442695, %v412_v54 }
 0x675   : > { %752 = vpow2.f32 %v648_v59 }
 0x67d   : > { %v751_v58 = vpop.eup %750 }
 0x67e   : > { %422 = vrot.lane.b32.xlu1 %v751_v58, %s783_s26 }
 0x67f   : > { %v753_v60 = vpop.eup %752 }
 0x680   : > { %v416_v61 = vadd.f32 1.0, %v753_v60 }
 0x682   : > { %754 = vrcp.f32 %v416_v61 }
 0x68c   : > { %v755_v62 = vpop.eup %754 }
 0x68d   : > { %v420_v1 = vmul.f32 %v755_v62, %v355_v45 }
 0x6f0   : > { %v423_v63 = vpop.permute.xlu1 %422 }
 0x6f1   : > { %v425_v0 = vmul.f32 %v755_v62, %v423_v63 }
 0x6f3   : > { %427 = vrot.lane.b32.xlu0 %v425_v0, %s784_s27 }
 0x765   : > { %v428_v2 = vpop.permute.xlu0 %427 }
 0x766   : > { %v430_v3 = vadd.f32 %v428_v2, %v420_v1 }
 0x768   : > { %756 = vtanh.f32 %v430_v3 }
 0x772   : > { %v757_v4 = vpop.eup %756 }
 0x773   : > { %433 = vrot.lane.b32.xlu1 %v757_v4, %s783_s26 }
 0x7e5   : > { %v434_v5 = vpop.permute.xlu1 %433 }
 0x7e6   : > { %v436_v6 = vmul.f32 %v755_v62, %v434_v5 }
 0x7e8   : > { %v440_v7 = vpack.c.bf16 %v436_v6, %v436_v6 }
 0x7ea   : > { %442 = vrot.lane.b32.xlu0 %v440_v7, %s784_s27 }
 0x85c   : > { %v443_v8 = vpop.permute.xlu0 %442 }
 0x85d   : > { %704 = vmatmul.mubr.msk.bf16.vlgmr.msra.gmra.mrb[4].mxu1 %vm214_vm2, %v443_v8 }
 0x930   : > { %v481_v10 = vpop.f32.mrb[4].mxu1 }
 0x931   : > { %v487_v11 = vadd.f32 %v481_v10, %v439_v9  ;;  %v705_v12 = vpop.f32.mrb[5].mxu1 }
 0x932   : > { %v484_v13 = vpop.f32.mrb[6].mxu1 }
 0x933   : > { %758 = vtanh.f32 %v487_v11  ;;  %v706_v14 = vpop.f32.mrb[7].mxu1  ;;  %v651_v16 = vmul.f32 -1.442695, %v487_v11 }
 0x935   : > { %760 = vpow2.f32 %v651_v16 }
 0x93d   : > { %v759_v15 = vpop.eup %758 }
 0x93e   : > { %497 = vrot.lane.b32.xlu1 %v759_v15, %s783_s26 }
 0x93f   : > { %v761_v17 = vpop.eup %760 }
 0x940   : > { %v491_v18 = vadd.f32 1.0, %v761_v17 }
 0x942   : > { %762 = vrcp.f32 %v491_v18 }
 0x94c   : > { %v763_v19 = vpop.eup %762 }
 0x94d   : > { %v495_v22 = vmul.f32 %v763_v19, %v430_v3 }
 0x9b0   : > { %v498_v20 = vpop.permute.xlu1 %497 }
 0x9b1   : > { %v500_v21 = vmul.f32 %v763_v19, %v498_v20 }
 0x9b3   : > { %502 = vrot.lane.b32.xlu0 %v500_v21, %s784_s27 }
 0xa25   : > { %v503_v23 = vpop.permute.xlu0 %502 }
 0xa26   : > { %v505_v24 = vadd.f32 %v503_v23, %v495_v22 }
 0xa28   : > { %764 = vtanh.f32 %v505_v24 }
 0xa32   : > { %v765_v25 = vpop.eup %764 }
 0xa33   : > { %508 = vrot.lane.b32.xlu1 %v765_v25, %s783_s26 }
 0xa37   : > { %518 = vrot.lane.b32.xlu1 %v505_v24, %s785_s28 }
 0xaa5   : > { %v509_v26 = vpop.permute.xlu1 %508 }
 0xaa6   : > { %v511_v27 = vmul.f32 %v763_v19, %v509_v26 }
 0xaa8   : > { %513 = vrot.lane.b32.xlu0 %v511_v27, %s784_s27  ;;  %v526_v30 = vpack.c.bf16 (!%p652_p5), %v511_v27, %v511_v27 }
 0xaa9   : > { %v519_v28 = vpop.permute.xlu1 %518 }
 0xaaa   : > { %521 = vst.msk [vmem:[#allocation3] sm:$0xff] %vm214_vm2, %v519_v28 }
 0xaac   : > { %539 = vrot.lane.b32.xlu0 (!%p652_p5), %v526_v30, %s787_s5 }
 0xb15   : > { %525 = sbr.rel (%p652_p5) target bundleno = 3088 (0xc10), region = 44 }
 0xb1a   : > { %v514_v29 = vpop.permute.xlu0 %513 }
 0xb1b   : > { %516 = vst.msk [vmem:[#allocation2] sm:$0xff] %vm214_vm2, %v514_v29 }
 0xb1e   : > { %v540_v34 = vpop.permute.xlu0 %539 }
 0xb1f   : > { %712 = vmatmul.mubr.msk.bf16.vlgmr.msra.gmra.mrb[0].mxu0 %vm214_vm2, %v540_v34 }
 0xbf2   : > { %v590_v36 = vpop.f32.mrb[0].mxu0 }
 0xbf3   : > { %v591_v37 = vadd.f32 %v653_v35, %v590_v36  ;;  %v713_v38 = vpop.f32.mrb[1].mxu0 }
 0xbf4   : > { %v593_v39 = vpop.f32.mrb[2].mxu0 }
 0xbf5   : > { %v657_v40 = vmul.f32 -1.442695, %v591_v37  ;;  %v714_v41 = vpop.f32.mrb[3].mxu0 }
 0xbf7   : > { %768 = vpow2.f32 %v657_v40 }
 0xc01   : > { %v769_v42 = vpop.eup %768 }
 0xc02   : > { %v599_v43 = vadd.f32 1.0, %v769_v42 }
 0xc04   : > { %770 = vrcp.f32 %v599_v43 }
 0xc0e   : > { %v771_v44 = vpop.eup %770 }
 0xc0f   : > { %603 = vst.msk [vmem:[%s887_s4] sm:$0xff] %vm602_vm4, %v771_v44 }
 0xc10 PF: > { %s14_s15 = sadd.s32 1, %s778_s15  }
 0xc11   : > { %p11_p6 = scmp.ge.s32.totalorder %s14_s15, 4  }
 0xc13   :  { %13 = sbr.rel (!%p11_p6) target bundleno = 1 (0x1), region = 73 }

</bundles_post_ra>
